<compile_context>
chip_gen: v6e
topology: v6e:2x2x1
jax: 0.10.0
libtpu: 0.0.40
codegen_flags: <defaults>
</compile_context>

<pallas_src>
import numpy as np
import jax
import jax.numpy as jnp
from jax import lax
from jax.experimental import pallas as pl
from jax.experimental.pallas import tpu as pltpu


def self_attention_kernel(x_ref, w_ref, start_ref, out_ref):
    x = x_ref[...]                                       # (TB, S, Hp), native dtype
    tb, S, Hp = x.shape

    # scores = <x, w>_H on the MXU, consuming x in its native dtype.  The
    # broadcast weight column (TB, Hp, 1) is tiny next to the x block, so no
    # full-block f32 upcast / product temporary is ever materialized.
    w_col = jnp.broadcast_to(w_ref[...].reshape(1, Hp, 1), (tb, Hp, 1))
    s3 = jnp.einsum("bsh,bhk->bsk", x, w_col,
                    preferred_element_type=jnp.float32)  # (TB, S, 1)
    scores = jnp.tanh(s3[:, :, 0])                       # (TB, S), lane-major

    # exp directly: tanh already bounds scores to [-1, 1]; the plain softmax
    # denominator cancels against the masked renormalization below.
    e = jnp.exp(scores)                                  # (TB, S)

    # Mask: zero the first start[b] timesteps of each row (front padding).
    col = lax.broadcasted_iota(jnp.int32, e.shape, 1)    # (TB, S)
    mask = (col >= start_ref[...]).astype(jnp.float32)   # start_ref: (TB, 1)
    masked = e * mask

    # Single normalization (== softmax -> mask -> renorm of the module).
    # Exact reciprocal: the (TB, 1) array is tiny, so accuracy is free.
    denom = jnp.sum(masked, axis=-1, keepdims=True)      # (TB, 1)
    attn = masked * pl.reciprocal(denom, approx=False)

    # Weighted sum over S on the MXU: per-row (1, S) x (S, Hp) contraction
    # (keeps the S-reduction in the matrix unit, no lane-broadcast relayout).
    out3 = jnp.einsum("bqs,bsh->bqh",
                      attn[:, None, :].astype(x.dtype), x,
                      preferred_element_type=jnp.float32)  # (TB, 1, Hp)
    out_ref[...] = out3[:, 0, :].astype(out_ref.dtype)


def _vmem_capacity_bytes():
    try:
        return int(pltpu.get_tpu_info().vmem_capacity_bytes)
    except Exception:
        return 64 << 20          # conservative fallback (v7x per-TensorCore VMEM)


def _choose_batch_tile(B, S, Hp, itemsize, per_buffer_budget):
    """Largest multiple-of-8 batch tile whose per-step working set fits the budget."""
    # Per batch-row cost per buffer: the x block, the lane-padded broadcast
    # weight column, and the small f32 score/attention temporaries.
    per_row = S * Hp * itemsize + Hp * 512 + 16 * S
    tb = max(8, (per_buffer_budget // per_row) // 8 * 8)
    b8 = ((B + 7) // 8) * 8
    tb = min(tb, b8)
    # Prefer >= 2 grid steps so the "parallel" batch axis can be sharded across
    # both v7x TensorCores (no-op on single-core v5e / v6e).
    if b8 // tb < 2 and tb > 8:
        half = ((b8 // 2) + 7) // 8 * 8
        tb = max(8, min(tb, half))
    return tb


def self_attention(inputs, attention_weights, lengths, *, batch_tile=None):
    """inputs: (B, S, H) f32 or bf16, attention_weights: (H,), lengths: (B,) int."""
    B, S, H = inputs.shape
    dtype = inputs.dtype
    itemsize = jnp.dtype(dtype).itemsize
    # NOTE: casting f32 inputs to bf16 here would ~halve HBM traffic (the kernel
    # accumulates in f32); left off to preserve the reference numerics exactly.

    # Lane-dense layout: pad H to a multiple of 128 (padded columns are zero,
    # contribute nothing to the scores and are sliced off the output).
    Hp = ((H + 127) // 128) * 128

    vmem_cap = _vmem_capacity_bytes()
    per_buffer_budget = max(1 << 20, vmem_cap // 8)
    tb = batch_tile or _choose_batch_tile(B, S, Hp, itemsize, per_buffer_budget)
    Bp = ((B + tb - 1) // tb) * tb          # pad batch; no whole-tensor fallback
    grid = (Bp // tb,)

    x = inputs
    if Bp != B or Hp != H:
        x = jnp.pad(x, ((0, Bp - B), (0, 0), (0, Hp - H)))
    w_col = jnp.pad(attention_weights, (0, Hp - H)).astype(dtype).reshape(Hp, 1)

    # First kept timestep per row: S - l if 0 < l < max(lengths), else 0
    # (l == 0 keeps the whole row, matching torch's `mask[i, :-0]` no-op).
    lengths = jnp.asarray(lengths).astype(jnp.int32)
    max_len = jnp.max(lengths)
    start = jnp.where((lengths < max_len) & (lengths > 0), S - lengths, 0)
    start = start.astype(jnp.int32).reshape(B, 1)
    if Bp != B:
        start = jnp.pad(start, ((0, Bp - B), (0, 0)))    # padded rows keep all (x is zero)

    # Double-buffered x block dominates; request what the step needs, capped at
    # ~75% of physical VMEM (leaves headroom for compiler scratch on every gen).
    x_block_bytes = tb * S * Hp * itemsize
    want = 2 * x_block_bytes + tb * Hp * 512 + 2 * tb * Hp * 4 + 16 * tb * S + (4 << 20)
    vmem_limit = int(min(vmem_cap * 3 // 4, max(want, 16 << 20)))

    out = pl.pallas_call(
        self_attention_kernel,
        out_shape=jax.ShapeDtypeStruct((Bp, Hp), jnp.float32),
        grid_spec=pltpu.PrefetchScalarGridSpec(
            num_scalar_prefetch=0,
            grid=grid,
            in_specs=[
                pl.BlockSpec((tb, S, Hp), lambda i: (i, 0, 0)),  # x, tiled over batch
                pl.BlockSpec((Hp, 1), lambda i: (0, 0)),         # weight column, untiled
                pl.BlockSpec((tb, 1), lambda i: (i, 0)),         # first-kept indices
            ],
            out_specs=pl.BlockSpec((tb, Hp), lambda i: (i, 0)),
        ),
        compiler_params=pltpu.CompilerParams(
            dimension_semantics=("parallel",),   # batch blocks shard across v7x's 2 TCs
            vmem_limit_bytes=vmem_limit,
        ),
    )(x, w_col, start)
    return out[:B, :H]


def get_mask(lengths, seq_len):
    """Mirror of SelfAttention.get_mask (used by the pure-JAX reference)."""
    max_len = jnp.max(lengths)
    idx = jnp.arange(seq_len, dtype=lengths.dtype)[None, :]      # (1, S)
    l = lengths[:, None]                                         # (B, 1)
    keep = (idx >= (seq_len - l)).astype(jnp.float32)            # (B, S)
    full = jnp.ones((lengths.shape[0], seq_len), dtype=jnp.float32)
    return jnp.where((l < max_len) & (l > 0), keep, full)


def reference(inputs, attention_weights, lengths):
    """Pure-JAX reference matching the PyTorch forward."""
    scores = jnp.tanh(inputs @ attention_weights)                # (B, S)
    scores = jax.nn.softmax(scores, axis=-1)
    mask = get_mask(lengths, inputs.shape[1])
    masked = scores * mask
    scores = masked / jnp.sum(masked, axis=-1, keepdims=True)
    weighted = inputs * scores[..., None]
    return jnp.sum(weighted, axis=1)


if __name__ == "__main__":
    key = jax.random.PRNGKey(0)
    k_x, k_w, k_x2 = jax.random.split(key, 3)

    # Case 1: shapes implied by the module (batch=2, seq=8, attention_size=32).
    B, S, H = 2, 8, 32
    inputs = jax.random.normal(k_x, (B, S, H), dtype=jnp.float32)
    # nn.init.uniform(self.attention_weights.data, -0.005, 0.005)
    attention_weights = jax.random.uniform(
        k_w, (H,), dtype=jnp.float32, minval=-0.005, maxval=0.005)
    lengths = jnp.array([8, 5], dtype=jnp.int32)   # second sample is front-padded

    out = jax.block_until_ready(self_attention(inputs, attention_weights, lengths))
    ref = jax.block_until_ready(reference(inputs, attention_weights, lengths))
    assert out.shape == (B, H)
    # Renormalization reciprocal is exact now; the residual difference is MXU
    # f32 matmul pass precision (both sides), comfortably inside 5e-3.
    assert np.allclose(np.asarray(out), np.asarray(ref), rtol=5e-3, atol=5e-3)

    # Case 2: batch not a multiple of 8 and H not a multiple of 128 — exercises
    # the batch/lane padding paths (replacing the old whole-tensor fallback).
    B2, S2, H2 = 5, 12, 160
    inputs2 = jax.random.normal(k_x2, (B2, S2, H2), dtype=jnp.float32)
    w2 = jax.random.uniform(k_w, (H2,), dtype=jnp.float32, minval=-0.005, maxval=0.005)
    lengths2 = jnp.array([12, 7, 12, 3, 9], dtype=jnp.int32)

    out2 = jax.block_until_ready(self_attention(inputs2, w2, lengths2))
    ref2 = jax.block_until_ready(reference(inputs2, w2, lengths2))
    assert out2.shape == (B2, H2)
    assert np.allclose(np.asarray(out2), np.asarray(ref2), rtol=5e-3, atol=5e-3)

    print("KERNEL_OK")
</pallas_src>

<mosaic_0001>
module attributes {stable_mosaic.version = 11 : i64} {
  func.func @self_attention_kernel(%arg0: i32, %arg1: memref<8x8x128xf32, #tpu.memory_space<vmem>>, %arg2: memref<128x1xf32, #tpu.memory_space<vmem>>, %arg3: memref<8x1xi32, #tpu.memory_space<vmem>>, %arg4: memref<8x128xf32, #tpu.memory_space<vmem>>) attributes {dimension_semantics = [#tpu.dimension_semantics<parallel>], iteration_bounds = array<i64: 1>, scalar_prefetch = 0 : i64, scratch_operands = 0 : i64, tpu.core_type = #tpu.core_type<tc>, window_params = [{transform_indices = @transform_0, window_bounds = array<i64: 8, 8, 128>}, {pipeline_mode = #tpu.pipeline_mode<synchronous>, transform_indices = @transform_1, window_bounds = array<i64: 128, 1>}, {transform_indices = @transform_2, window_bounds = array<i64: 8, 1>}, {transform_indices = @transform_3, window_bounds = array<i64: 8, 128>}]} {
    %c0 = arith.constant 0 : index
    %c0_0 = arith.constant 0 : index
    %c0_1 = arith.constant 0 : index
    %0 = vector.load %arg1[%c0, %c0_0, %c0_1] : memref<8x8x128xf32, #tpu.memory_space<vmem>>, vector<8x8x128xf32>
    %c0_2 = arith.constant 0 : index
    %c0_3 = arith.constant 0 : index
    %1 = vector.load %arg2[%c0_2, %c0_3] : memref<128x1xf32, #tpu.memory_space<vmem>>, vector<128x1xf32>
    %2 = vector.shape_cast %1 : vector<128x1xf32> to vector<1x128x1xf32>
    %3 = vector.shape_cast %2 : vector<1x128x1xf32> to vector<1x128x1xf32>
    %4 = vector.broadcast %3 : vector<1x128x1xf32> to vector<8x128x1xf32>
    "tpu.trace_start"() <{level = 10 : i32, message = "bsh,bhk->bsk"}> : () -> ()
    %cst = arith.constant dense<0.000000e+00> : vector<8x8x1xf32>
    %5 = tpu.matmul %0, %4, %cst {dimension_numbers = #tpu.dot_dimension_numbers<[2], [1], [1], [2], [0, 0, 0, 1, 1, 2], [0], [0]>} : vector<8x8x128xf32>, vector<8x128x1xf32>, vector<8x8x1xf32> -> vector<8x8x1xf32>
    "tpu.trace_stop"() : () -> ()
    %6 = vector.shape_cast %5 : vector<8x8x1xf32> to vector<8x8xf32>
    %7 = math.tanh %6 : vector<8x8xf32>
    %8 = math.exp %7 : vector<8x8xf32>
    %9 = tpu.iota {dimensions = array<i32: 1>} : vector<8x8xi32>
    %c0_4 = arith.constant 0 : index
    %c0_5 = arith.constant 0 : index
    %10 = vector.load %arg3[%c0_4, %c0_5] : memref<8x1xi32, #tpu.memory_space<vmem>>, vector<8x1xi32>
    %11 = vector.broadcast %10 : vector<8x1xi32> to vector<8x8xi32>
    %12 = arith.cmpi sge, %9, %11 : vector<8x8xi32>
    %13 = arith.extui %12 : vector<8x8xi1> to vector<8x8xi32>
    %14 = arith.sitofp %13 : vector<8x8xi32> to vector<8x8xf32>
    %15 = arith.mulf %8, %14 : vector<8x8xf32>
    %cst_6 = arith.constant dense<0.000000e+00> : vector<8xf32>
    %16 = vector.multi_reduction <add>, %15, %cst_6 [1] : vector<8x8xf32> to vector<8xf32>
    %17 = vector.shape_cast %16 : vector<8xf32> to vector<8x1xf32>
    %18 = tpu.reciprocal %17 : vector<8x1xf32> -> vector<8x1xf32>
    %19 = vector.broadcast %18 : vector<8x1xf32> to vector<8x8xf32>
    %20 = arith.mulf %15, %19 : vector<8x8xf32>
    %21 = vector.shape_cast %20 : vector<8x8xf32> to vector<8x1x8xf32>
    "tpu.trace_start"() <{level = 10 : i32, message = "bqs,bsh->bqh"}> : () -> ()
    %cst_7 = arith.constant dense<0.000000e+00> : vector<8x1x128xf32>
    %22 = tpu.matmul %21, %0, %cst_7 {dimension_numbers = #tpu.dot_dimension_numbers<[2], [1], [1], [2], [0, 0, 0, 1, 1, 2], [0], [0]>} : vector<8x1x8xf32>, vector<8x8x128xf32>, vector<8x1x128xf32> -> vector<8x1x128xf32>
    "tpu.trace_stop"() : () -> ()
    %23 = vector.shape_cast %22 : vector<8x1x128xf32> to vector<8x128xf32>
    %c0_8 = arith.constant 0 : index
    %c0_9 = arith.constant 0 : index
    %24 = vector.load %arg4[%c0_8, %c0_9] : memref<8x128xf32, #tpu.memory_space<vmem>>, vector<8x128xf32>
    tpu.vector_store %arg4[%c0_8, %c0_9], %23 {strides = array<i32>} : memref<8x128xf32, #tpu.memory_space<vmem>>, vector<8x128xf32>,
    return
  }
  func.func @transform_0(%arg0: i32) -> (i32, i32, i32) {
    %c0_i32 = arith.constant 0 : i32
    %c0_i32_0 = arith.constant 0 : i32
    %c0_i32_1 = arith.constant 0 : i32
    return %arg0, %c0_i32, %c0_i32_0 : i32, i32, i32
  }
  func.func @transform_1(%arg0: i32) -> (i32, i32) {
    %c0_i32 = arith.constant 0 : i32
    %c0_i32_0 = arith.constant 0 : i32
    %c0_i32_1 = arith.constant 0 : i32
    return %c0_i32, %c0_i32_0 : i32, i32
  }
  func.func @transform_2(%arg0: i32) -> (i32, i32) {
    %c0_i32 = arith.constant 0 : i32
    %c0_i32_0 = arith.constant 0 : i32
    return %arg0, %c0_i32 : i32, i32
  }
  func.func @transform_3(%arg0: i32) -> (i32, i32) {
    %c0_i32 = arith.constant 0 : i32
    %c0_i32_0 = arith.constant 0 : i32
    return %arg0, %c0_i32 : i32, i32
  }
}

</mosaic_0001>

<bundles_post_ra>
// kernel: tpu_custom_call.1
= control target key start
LH: loop header
LB: loop body
LE: loop exit
PB: predicated region body
PF: predicated region fallthrough
CT: control target
= control target key end

     0   :  { %v2059_v1 = vmov 0.0   ;;  %s2636_s0 = inlined_call_operand.vmem [shape: f32[8,8,128], index: 0, kind: input, shape index: {}]   ;;  %s2637_s1 = inlined_call_operand.vmem [shape: f32[128,1], index: 1, kind: input, shape index: {}]   ;;  %s2638_s2 = inlined_call_operand.vmem [shape: s32[8,1], index: 2, kind: input, shape index: {}]   ;;  %s2639_s3 = inlined_call_operand.hbm [shape: f32[8,128], index: 3, kind: output, shape index: {}]  }
   0x1   :  { %v2086_v0 = vld [vmem:[%s2637_s1 + $0x78] sm:$0xff]  ;;  %1677 = vmatprep.subr.mxu0 %v2059_v1  ;;  %1712 = vmatprep.subr.mxu1 %v2059_v1  ;;  %v2093_v2 = vld [vmem:[%s2637_s1 + $0x70] sm:$0xff]  ;;  %v2102_v3 = vld [vmem:[%s2637_s1 + $0x68] sm:$0xff] }
   0x2   :  { %1678 = vmatpush3.msra.mxu0 %v2086_v0  ;;  %1713 = vmatpush3.msra.mxu1 %v2086_v0  ;;  %v2111_v4 = vld [vmem:[%s2637_s1 + $0x60] sm:$0xff]  ;;  %v2120_v5 = vld [vmem:[%s2637_s1 + $0x58] sm:$0xff] }
   0x3   :  { %1679 = vmatprep.subr.mxu0 %v2059_v1  ;;  %1714 = vmatprep.subr.mxu1 %v2059_v1 }
   0x4   :  { %1680 = vmatpush3.msra.mxu0 %v2093_v2  ;;  %1715 = vmatpush3.msra.mxu1 %v2093_v2 }
   0x5   :  { %1681 = vmatprep.subr.mxu0 %v2059_v1  ;;  %1716 = vmatprep.subr.mxu1 %v2059_v1 }
   0x6   :  { %1682 = vmatpush3.msra.mxu0 %v2102_v3  ;;  %1717 = vmatpush3.msra.mxu1 %v2102_v3 }
   0x7   :  { %1683 = vmatprep.subr.mxu0 %v2059_v1  ;;  %1718 = vmatprep.subr.mxu1 %v2059_v1 }
   0x8   :  { %8 = vsyncpa [#allocation3], 0  ;;  %1684 = vmatpush3.msra.mxu0 %v2111_v4  ;;  %1719 = vmatpush3.msra.mxu1 %v2111_v4  ;;  %v2129_v6 = vld [vmem:[%s2637_s1 + $0x50] sm:$0xff]  ;;  %v625_v7 = vld [vmem:[%s2638_s2] sm:$0xff]  ;;  %v2060_v8 = vmov 0   ;;  %vm2061_vm0 = vmmov 0   ;;  %v623_v25 = vlaneseq }
   0x9   :  { %1685 = vmatprep.subr.mxu0 %v2059_v1  ;;  %1720 = vmatprep.subr.mxu1 %v2059_v1  ;;  %v2143_v9 = vld [vmem:[%s2637_s1 + $0x48] sm:$0xff]  ;;  %v2151_v10 = vld [vmem:[%s2637_s1 + $0x40] sm:$0xff]  ;;  %v2160_v11 = vld [vmem:[%s2637_s1 + $0x38] sm:$0xff]  ;;  %vm769_vm2 = vcmask 1041409   ;;  %vm771_vm3 = vcmask 1042434   ;;  %vm773_vm4 = vcmask 1043459  }
   0xa   :  { %1686 = vmatpush3.msra.mxu0 %v2120_v5  ;;  %1721 = vmatpush3.msra.mxu1 %v2120_v5  ;;  %v2169_v12 = vld [vmem:[%s2637_s1 + $0x30] sm:$0xff]  ;;  %v2178_v13 = vld [vmem:[%s2637_s1 + $0x28] sm:$0xff]  ;;  %v2187_v14 = vld [vmem:[%s2637_s1 + $0x20] sm:$0xff]  ;;  %v2463_v26 = vshrl.u32 %v623_v25, 7  ;;  %v2469_v27 = vand.u32 127, %v623_v25  ;;  %vm775_vm5 = vcmask 1044484  }
   0xb   :  { %1687 = vmatprep.subr.mxu0 %v2059_v1  ;;  %1722 = vmatprep.subr.mxu1 %v2059_v1  ;;  %v2196_v15 = vld [vmem:[%s2637_s1 + $0x18] sm:$0xff]  ;;  %v2205_v16 = vld [vmem:[%s2637_s1 + $0x10] sm:$0xff]  ;;  %v2214_v17 = vld [vmem:[%s2637_s1 + $0x8] sm:$0xff]  ;;  %vm777_vm6 = vcmask 1045509   ;;  %vm779_vm7 = vcmask 1046534   ;;  %vm781_vm8 = vcmask 1047559  }
   0xc   :  { %2001 = vset.pattern.permute.xlu0 %v2060_v8  ;;  %1688 = vmatpush3.msra.mxu0 %v2129_v6  ;;  %v2223_v18 = vld [vmem:[%s2637_s1] sm:$0xff]  ;;  %v2237_v20 = vld [vmem:[%s2636_s0 + $0x8] sm:$0xff]  ;;  %v2312_v21 = vld [vmem:[%s2636_s0 + $0x10] sm:$0xff]  ;;  %v642_v30 = vsub.s32 1, %v2463_v26  ;;  %v635_v31 = vsub.s32 0, %v2463_v26  ;;  %v649_v33 = vsub.s32 2, %v2463_v26 }
   0xd   :  { %1723 = vmatpush3.msra.mxu1 %v2129_v6  ;;  %627 = vperm.xlu0 %2001, %v625_v7   ;;  %v2232_v19 = vld [vmem:[%s2636_s0] sm:$0xff]  ;;  %v2317_v22 = vld [vmem:[%s2636_s0 + $0x18] sm:$0xff]  ;;  %v2397_v24 = vld [vmem:[%s2636_s0 + $0x28] sm:$0xff]  ;;  %v656_v34 = vsub.s32 3, %v2463_v26  ;;  %v663_v40 = vsub.s32 4, %v2463_v26  ;;  %v670_v41 = vsub.s32 5, %v2463_v26 }
   0xe   :  { %1689 = vmatprep.subr.mxu0 %v2059_v1  ;;  %1724 = vmatprep.subr.mxu1 %v2059_v1  ;;  %v2392_v23 = vld [vmem:[%s2636_s0 + $0x20] sm:$0xff]  ;;  %v2476_v28 = vld [vmem:[%s2636_s0 + $0x30] sm:$0xff]  ;;  %v2481_v29 = vld [vmem:[%s2636_s0 + $0x38] sm:$0xff]  ;;  %v677_v44 = vsub.s32 6, %v2463_v26  ;;  %v684_v45 = vsub.s32 7, %v2463_v26  ;;  %vm784_vm9 = vcmask 64512  }
   0xf   :  { %1690 = vmatpush3.msra.mxu0 %v2143_v9  ;;  %1725 = vmatpush3.msra.mxu1 %v2143_v9  ;;  %s2062_s0 = smov [#allocation2]  }
  0x10   :  { %1691 = vmatprep.subr.mxu0 %v2059_v1  ;;  %1726 = vmatprep.subr.mxu1 %v2059_v1  ;;  %s1508_s5 = sshll.u32 %s2062_s0, 4  ;;  %s1509_s5 = int_to_ptr.vmem [resolvable:$true] %s1508_s5 }
  0x11   :  { %1692 = vmatpush3.msra.mxu0 %v2151_v10  ;;  %1727 = vmatpush3.msra.mxu1 %v2151_v10  ;;  %s2037_s6 = scalar_lea.vmem %s1509_s5, 128  ;;  %p2042_p1 = scmp.lt.s32.totalorder %s1509_s5, %s1509_s5 }
  0x12   :  { %1693 = vmatprep.subr.mxu0 %v2059_v1  ;;  %1728 = vmatprep.subr.mxu1 %v2059_v1  ;;  %p2038_p0 = scmp.ne.s32.totalorder %s1509_s5, %s2037_s6  ;;  %p2043_p2 = scmp.lt.s32.totalorder %s2037_s6, %s2037_s6 }
  0x13   :  { %1694 = vmatpush3.msra.mxu0 %v2160_v11  ;;  %1729 = vmatpush3.msra.mxu1 %v2160_v11 }
  0x14   :  { %1695 = vmatprep.subr.mxu0 %v2059_v1  ;;  %1730 = vmatprep.subr.mxu1 %v2059_v1  ;;  %p2044_p3 = por %p2043_p2, %p2042_p1 }
  0x15   :  { %1696 = vmatpush3.msra.mxu0 %v2169_v12  ;;  %1731 = vmatpush3.msra.mxu1 %v2169_v12 }
  0x16   :  { %1697 = vmatprep.subr.mxu0 %v2059_v1  ;;  %1732 = vmatprep.subr.mxu1 %v2059_v1  ;;  %p2045_p4 = pnand %p2044_p3, %p2038_p0 }
  0x17   :  { %1698 = vmatpush3.msra.mxu0 %v2178_v13  ;;  %1733 = vmatpush3.msra.mxu1 %v2178_v13 }
  0x18   :  { %1699 = vmatprep.subr.mxu0 %v2059_v1  ;;  %1734 = vmatprep.subr.mxu1 %v2059_v1 }
  0x19   :  { %1700 = vmatpush3.msra.mxu0 %v2187_v14  ;;  %1735 = vmatpush3.msra.mxu1 %v2187_v14 }
  0x1a   :  { %1701 = vmatprep.subr.mxu0 %v2059_v1  ;;  %1736 = vmatprep.subr.mxu1 %v2059_v1 }
  0x1b   :  { %1702 = vmatpush3.msra.mxu0 %v2196_v15  ;;  %1737 = vmatpush3.msra.mxu1 %v2196_v15 }
  0x1c   :  { %1703 = vmatprep.subr.mxu0 %v2059_v1  ;;  %1738 = vmatprep.subr.mxu1 %v2059_v1 }
  0x1d   :  { %1704 = vmatpush3.msra.mxu0 %v2205_v16  ;;  %1739 = vmatpush3.msra.mxu1 %v2205_v16 }
  0x1e   :  { %1705 = vmatprep.subr.mxu0 %v2059_v1  ;;  %1740 = vmatprep.subr.mxu1 %v2059_v1 }
  0x1f   :  { %1706 = vmatpush3.msra.mxu0 %v2214_v17  ;;  %1741 = vmatpush3.msra.mxu1 %v2214_v17 }
  0x20   :  { %1707 = vmatprep.subr.mxu0 %v2059_v1  ;;  %1742 = vmatprep.subr.mxu1 %v2059_v1 }
  0x21   :  { %1708 = vmatpush3.msra.mxu0 %v2223_v18  ;;  %1709 = vmatprep.mubr.msk.f32.mxu0 %vm2061_vm0, %v2059_v1 }
  0x22   :  { %1743 = vmatpush3.msra.mxu1 %v2223_v18  ;;  %1744 = vmatprep.mubr.msk.f32.mxu1 %vm2061_vm0, %v2059_v1 }
  0x23   :  { %1710 = vmatmul.mubr.f32.vlgmr.msra.gmra.mxu0 %v2232_v19  ;;  %1745 = vmatmul.mubr.f32.vlgmr.msra.gmra.mxu1 %v2237_v20 }
  0x24   :  { %1747 = vmatprep.subr.mxu0 %v2059_v1  ;;  %1782 = vmatprep.subr.mxu1 %v2059_v1 }
  0x25   :  { %1748 = vmatpush3.msra.mxu0 %v2086_v0  ;;  %1783 = vmatpush3.msra.mxu1 %v2086_v0 }
  0x26   :  { %1749 = vmatprep.subr.mxu0 %v2059_v1  ;;  %1784 = vmatprep.subr.mxu1 %v2059_v1 }
  0x27   :  { %1750 = vmatpush3.msra.mxu0 %v2093_v2  ;;  %1785 = vmatpush3.msra.mxu1 %v2093_v2 }
  0x28   :  { %1751 = vmatprep.subr.mxu0 %v2059_v1  ;;  %1786 = vmatprep.subr.mxu1 %v2059_v1 }
  0x29   :  { %1752 = vmatpush3.msra.mxu0 %v2102_v3  ;;  %1787 = vmatpush3.msra.mxu1 %v2102_v3 }
  0x2a   :  { %1753 = vmatprep.subr.mxu0 %v2059_v1  ;;  %1788 = vmatprep.subr.mxu1 %v2059_v1 }
  0x2b   :  { %1754 = vmatpush3.msra.mxu0 %v2111_v4  ;;  %1789 = vmatpush3.msra.mxu1 %v2111_v4 }
  0x2c   :  { %1755 = vmatprep.subr.mxu0 %v2059_v1  ;;  %1790 = vmatprep.subr.mxu1 %v2059_v1 }
  0x2d   :  { %1756 = vmatpush3.msra.mxu0 %v2120_v5  ;;  %1791 = vmatpush3.msra.mxu1 %v2120_v5 }
  0x2e   :  { %1757 = vmatprep.subr.mxu0 %v2059_v1  ;;  %1792 = vmatprep.subr.mxu1 %v2059_v1 }
  0x2f   :  { %1758 = vmatpush3.msra.mxu0 %v2129_v6  ;;  %1793 = vmatpush3.msra.mxu1 %v2129_v6 }
  0x30   :  { %1759 = vmatprep.subr.mxu0 %v2059_v1  ;;  %1794 = vmatprep.subr.mxu1 %v2059_v1 }
  0x31   :  { %1760 = vmatpush3.msra.mxu0 %v2143_v9  ;;  %1795 = vmatpush3.msra.mxu1 %v2143_v9 }
  0x32   :  { %1761 = vmatprep.subr.mxu0 %v2059_v1  ;;  %1796 = vmatprep.subr.mxu1 %v2059_v1 }
  0x33   :  { %1762 = vmatpush3.msra.mxu0 %v2151_v10  ;;  %1797 = vmatpush3.msra.mxu1 %v2151_v10 }
  0x34   :  { %1763 = vmatprep.subr.mxu0 %v2059_v1  ;;  %1798 = vmatprep.subr.mxu1 %v2059_v1 }
  0x35   :  { %1764 = vmatpush3.msra.mxu0 %v2160_v11  ;;  %1799 = vmatpush3.msra.mxu1 %v2160_v11 }
  0x36   :  { %1765 = vmatprep.subr.mxu0 %v2059_v1  ;;  %1800 = vmatprep.subr.mxu1 %v2059_v1 }
  0x37   :  { %1766 = vmatpush3.msra.mxu0 %v2169_v12  ;;  %1801 = vmatpush3.msra.mxu1 %v2169_v12 }
  0x38   :  { %1767 = vmatprep.subr.mxu0 %v2059_v1  ;;  %1802 = vmatprep.subr.mxu1 %v2059_v1 }
  0x39   :  { %1768 = vmatpush3.msra.mxu0 %v2178_v13  ;;  %1803 = vmatpush3.msra.mxu1 %v2178_v13 }
  0x3a   :  { %1769 = vmatprep.subr.mxu0 %v2059_v1  ;;  %1804 = vmatprep.subr.mxu1 %v2059_v1 }
  0x3b   :  { %1770 = vmatpush3.msra.mxu0 %v2187_v14  ;;  %1805 = vmatpush3.msra.mxu1 %v2187_v14 }
  0x3c   :  { %1771 = vmatprep.subr.mxu0 %v2059_v1  ;;  %1806 = vmatprep.subr.mxu1 %v2059_v1 }
  0x3d   :  { %1772 = vmatpush3.msra.mxu0 %v2196_v15  ;;  %1807 = vmatpush3.msra.mxu1 %v2196_v15 }
  0x3e   :  { %1773 = vmatprep.subr.mxu0 %v2059_v1  ;;  %1808 = vmatprep.subr.mxu1 %v2059_v1 }
  0x3f   :  { %1774 = vmatpush3.msra.mxu0 %v2205_v16  ;;  %1809 = vmatpush3.msra.mxu1 %v2205_v16 }
  0x40   :  { %1775 = vmatprep.subr.mxu0 %v2059_v1  ;;  %1810 = vmatprep.subr.mxu1 %v2059_v1 }
  0x41   :  { %1776 = vmatpush3.msra.mxu0 %v2214_v17  ;;  %1811 = vmatpush3.msra.mxu1 %v2214_v17 }
  0x42   :  { %1777 = vmatprep.subr.mxu0 %v2059_v1  ;;  %1812 = vmatprep.subr.mxu1 %v2059_v1 }
  0x43   :  { %1778 = vmatpush3.msra.mxu0 %v2223_v18  ;;  %1779 = vmatprep.mubr.msk.f32.mxu0 %vm2061_vm0, %v2059_v1 }
  0x44   :  { %1813 = vmatpush3.msra.mxu1 %v2223_v18  ;;  %1814 = vmatprep.mubr.msk.f32.mxu1 %vm2061_vm0, %v2059_v1 }
  0x45   :  { %1780 = vmatmul.mubr.f32.vlgmr.msra.gmra.mxu0 %v2312_v21  ;;  %1815 = vmatmul.mubr.f32.vlgmr.msra.gmra.mxu1 %v2317_v22 }
  0x46   :  { %1817 = vmatprep.subr.mxu0 %v2059_v1  ;;  %1852 = vmatprep.subr.mxu1 %v2059_v1 }
  0x47   :  { %1818 = vmatpush3.msra.mxu0 %v2086_v0  ;;  %1853 = vmatpush3.msra.mxu1 %v2086_v0 }
  0x48   :  { %1819 = vmatprep.subr.mxu0 %v2059_v1  ;;  %1854 = vmatprep.subr.mxu1 %v2059_v1 }
  0x49   :  { %1820 = vmatpush3.msra.mxu0 %v2093_v2  ;;  %1855 = vmatpush3.msra.mxu1 %v2093_v2 }
  0x4a   :  { %1821 = vmatprep.subr.mxu0 %v2059_v1  ;;  %1856 = vmatprep.subr.mxu1 %v2059_v1 }
  0x4b   :  { %1822 = vmatpush3.msra.mxu0 %v2102_v3  ;;  %1857 = vmatpush3.msra.mxu1 %v2102_v3 }
  0x4c   :  { %1823 = vmatprep.subr.mxu0 %v2059_v1  ;;  %1858 = vmatprep.subr.mxu1 %v2059_v1 }
  0x4d   :  { %1824 = vmatpush3.msra.mxu0 %v2111_v4  ;;  %1859 = vmatpush3.msra.mxu1 %v2111_v4 }
  0x4e   :  { %1825 = vmatprep.subr.mxu0 %v2059_v1  ;;  %1860 = vmatprep.subr.mxu1 %v2059_v1 }
  0x4f   :  { %1826 = vmatpush3.msra.mxu0 %v2120_v5  ;;  %1861 = vmatpush3.msra.mxu1 %v2120_v5 }
  0x50   :  { %1827 = vmatprep.subr.mxu0 %v2059_v1  ;;  %1862 = vmatprep.subr.mxu1 %v2059_v1 }
  0x51   :  { %1828 = vmatpush3.msra.mxu0 %v2129_v6  ;;  %1863 = vmatpush3.msra.mxu1 %v2129_v6 }
  0x52   :  { %1829 = vmatprep.subr.mxu0 %v2059_v1  ;;  %1864 = vmatprep.subr.mxu1 %v2059_v1 }
  0x53   :  { %1830 = vmatpush3.msra.mxu0 %v2143_v9  ;;  %1865 = vmatpush3.msra.mxu1 %v2143_v9 }
  0x54   :  { %1831 = vmatprep.subr.mxu0 %v2059_v1  ;;  %1866 = vmatprep.subr.mxu1 %v2059_v1 }
  0x55   :  { %1832 = vmatpush3.msra.mxu0 %v2151_v10  ;;  %1867 = vmatpush3.msra.mxu1 %v2151_v10 }
  0x56   :  { %1833 = vmatprep.subr.mxu0 %v2059_v1  ;;  %1868 = vmatprep.subr.mxu1 %v2059_v1 }
  0x57   :  { %1834 = vmatpush3.msra.mxu0 %v2160_v11  ;;  %1869 = vmatpush3.msra.mxu1 %v2160_v11 }
  0x58   :  { %1835 = vmatprep.subr.mxu0 %v2059_v1  ;;  %1870 = vmatprep.subr.mxu1 %v2059_v1 }
  0x59   :  { %1836 = vmatpush3.msra.mxu0 %v2169_v12  ;;  %1871 = vmatpush3.msra.mxu1 %v2169_v12 }
  0x5a   :  { %1837 = vmatprep.subr.mxu0 %v2059_v1  ;;  %1872 = vmatprep.subr.mxu1 %v2059_v1 }
  0x5b   :  { %1838 = vmatpush3.msra.mxu0 %v2178_v13  ;;  %1873 = vmatpush3.msra.mxu1 %v2178_v13 }
  0x5c   :  { %1839 = vmatprep.subr.mxu0 %v2059_v1  ;;  %1874 = vmatprep.subr.mxu1 %v2059_v1 }
  0x5d   :  { %1840 = vmatpush3.msra.mxu0 %v2187_v14  ;;  %1875 = vmatpush3.msra.mxu1 %v2187_v14 }
  0x5e   :  { %1841 = vmatprep.subr.mxu0 %v2059_v1  ;;  %1876 = vmatprep.subr.mxu1 %v2059_v1 }
  0x5f   :  { %1842 = vmatpush3.msra.mxu0 %v2196_v15  ;;  %1877 = vmatpush3.msra.mxu1 %v2196_v15 }
  0x60   :  { %1843 = vmatprep.subr.mxu0 %v2059_v1  ;;  %1878 = vmatprep.subr.mxu1 %v2059_v1 }
  0x61   :  { %1844 = vmatpush3.msra.mxu0 %v2205_v16  ;;  %1879 = vmatpush3.msra.mxu1 %v2205_v16 }
  0x62   :  { %1845 = vmatprep.subr.mxu0 %v2059_v1  ;;  %1880 = vmatprep.subr.mxu1 %v2059_v1 }
  0x63   :  { %1846 = vmatpush3.msra.mxu0 %v2214_v17  ;;  %1881 = vmatpush3.msra.mxu1 %v2214_v17 }
  0x64   :  { %1847 = vmatprep.subr.mxu0 %v2059_v1  ;;  %1882 = vmatprep.subr.mxu1 %v2059_v1 }
  0x65   :  { %1848 = vmatpush3.msra.mxu0 %v2223_v18  ;;  %1849 = vmatprep.mubr.msk.f32.mxu0 %vm2061_vm0, %v2059_v1 }
  0x66   :  { %1883 = vmatpush3.msra.mxu1 %v2223_v18  ;;  %1884 = vmatprep.mubr.msk.f32.mxu1 %vm2061_vm0, %v2059_v1 }
  0x67   :  { %1850 = vmatmul.mubr.f32.vlgmr.msra.gmra.mxu0 %v2392_v23  ;;  %1885 = vmatmul.mubr.f32.vlgmr.msra.gmra.mxu1 %v2397_v24 }
  0x68   :  { %1887 = vmatprep.subr.mxu0 %v2059_v1  ;;  %1922 = vmatprep.subr.mxu1 %v2059_v1 }
  0x69   :  { %1888 = vmatpush3.msra.mxu0 %v2086_v0  ;;  %1923 = vmatpush3.msra.mxu1 %v2086_v0 }
  0x6a   :  { %1889 = vmatprep.subr.mxu0 %v2059_v1  ;;  %1924 = vmatprep.subr.mxu1 %v2059_v1 }
  0x6b   :  { %1890 = vmatpush3.msra.mxu0 %v2093_v2  ;;  %1925 = vmatpush3.msra.mxu1 %v2093_v2 }
  0x6c   :  { %1891 = vmatprep.subr.mxu0 %v2059_v1  ;;  %1926 = vmatprep.subr.mxu1 %v2059_v1 }
  0x6d   :  { %1892 = vmatpush3.msra.mxu0 %v2102_v3  ;;  %1927 = vmatpush3.msra.mxu1 %v2102_v3 }
  0x6e   :  { %1893 = vmatprep.subr.mxu0 %v2059_v1  ;;  %1928 = vmatprep.subr.mxu1 %v2059_v1 }
  0x6f   :  { %1894 = vmatpush3.msra.mxu0 %v2111_v4  ;;  %1929 = vmatpush3.msra.mxu1 %v2111_v4 }
  0x70   :  { %1895 = vmatprep.subr.mxu0 %v2059_v1  ;;  %1930 = vmatprep.subr.mxu1 %v2059_v1 }
  0x71   :  { %1896 = vmatpush3.msra.mxu0 %v2120_v5  ;;  %1931 = vmatpush3.msra.mxu1 %v2120_v5 }
  0x72   :  { %1897 = vmatprep.subr.mxu0 %v2059_v1  ;;  %1932 = vmatprep.subr.mxu1 %v2059_v1 }
  0x73   :  { %1898 = vmatpush3.msra.mxu0 %v2129_v6  ;;  %1933 = vmatpush3.msra.mxu1 %v2129_v6 }
  0x74   :  { %1899 = vmatprep.subr.mxu0 %v2059_v1  ;;  %1934 = vmatprep.subr.mxu1 %v2059_v1 }
  0x75   :  { %1900 = vmatpush3.msra.mxu0 %v2143_v9  ;;  %1935 = vmatpush3.msra.mxu1 %v2143_v9 }
  0x76   :  { %1901 = vmatprep.subr.mxu0 %v2059_v1  ;;  %1936 = vmatprep.subr.mxu1 %v2059_v1 }
  0x77   :  { %1902 = vmatpush3.msra.mxu0 %v2151_v10  ;;  %1937 = vmatpush3.msra.mxu1 %v2151_v10 }
  0x78   :  { %1903 = vmatprep.subr.mxu0 %v2059_v1  ;;  %1938 = vmatprep.subr.mxu1 %v2059_v1 }
  0x79   :  { %1904 = vmatpush3.msra.mxu0 %v2160_v11  ;;  %1939 = vmatpush3.msra.mxu1 %v2160_v11 }
  0x7a   :  { %1905 = vmatprep.subr.mxu0 %v2059_v1  ;;  %1940 = vmatprep.subr.mxu1 %v2059_v1 }
  0x7b   :  { %1906 = vmatpush3.msra.mxu0 %v2169_v12  ;;  %1941 = vmatpush3.msra.mxu1 %v2169_v12 }
  0x7c   :  { %1907 = vmatprep.subr.mxu0 %v2059_v1  ;;  %1942 = vmatprep.subr.mxu1 %v2059_v1 }
  0x7d   :  { %1908 = vmatpush3.msra.mxu0 %v2178_v13  ;;  %1943 = vmatpush3.msra.mxu1 %v2178_v13 }
  0x7e   :  { %1909 = vmatprep.subr.mxu0 %v2059_v1  ;;  %1944 = vmatprep.subr.mxu1 %v2059_v1 }
  0x7f   :  { %1910 = vmatpush3.msra.mxu0 %v2187_v14  ;;  %1945 = vmatpush3.msra.mxu1 %v2187_v14 }
  0x80   :  { %1911 = vmatprep.subr.mxu0 %v2059_v1  ;;  %1946 = vmatprep.subr.mxu1 %v2059_v1 }
  0x81   :  { %1912 = vmatpush3.msra.mxu0 %v2196_v15  ;;  %1947 = vmatpush3.msra.mxu1 %v2196_v15 }
  0x82   :  { %1913 = vmatprep.subr.mxu0 %v2059_v1  ;;  %1948 = vmatprep.subr.mxu1 %v2059_v1 }
  0x83   :  { %1914 = vmatpush3.msra.mxu0 %v2205_v16  ;;  %1949 = vmatpush3.msra.mxu1 %v2205_v16 }
  0x84   :  { %1915 = vmatprep.subr.mxu0 %v2059_v1  ;;  %1950 = vmatprep.subr.mxu1 %v2059_v1 }
  0x85   :  { %1916 = vmatpush3.msra.mxu0 %v2214_v17  ;;  %1951 = vmatpush3.msra.mxu1 %v2214_v17 }
  0x86   :  { %1917 = vmatprep.subr.mxu0 %v2059_v1  ;;  %1952 = vmatprep.subr.mxu1 %v2059_v1 }
  0x87   :  { %1918 = vmatpush3.msra.mxu0 %v2223_v18  ;;  %1919 = vmatprep.mubr.msk.f32.mxu0 %vm2061_vm0, %v2059_v1 }
  0x88   :  { %1953 = vmatpush3.msra.mxu1 %v2223_v18  ;;  %1954 = vmatprep.mubr.msk.f32.mxu1 %vm2061_vm0, %v2059_v1  ;;  %v628_v32 = vpop.permute.xlu0 %627 }
  0x89   :  { %1920 = vmatmul.mubr.f32.vlgmr.msra.gmra.mxu0 %v2476_v28  ;;  %1955 = vmatmul.mubr.f32.vlgmr.msra.gmra.mxu1 %v2481_v29  ;;  %vm629_vm1 = vcmp.ge.s32.totalorder %v2469_v27, %v628_v32 }
  0x8a   :  { %v1516_v35 = vsel %vm629_vm1, 1.0, %v2059_v1  ;;  %2002 = vset.pattern.permute.xlu1 %v2060_v8  ;;  %1957 = vmatprep.subr.mxu0 %v2059_v1 }
  0x8b   :  { %v643_v36 = vrot.slane %v1516_v35, %v642_v30  ;;  %v636_v37 = vrot.slane %v1516_v35, %v635_v31  ;;  %1958 = vmatpush3.msra.mxu0 %v2232_v19  ;;  %1959 = vmatprep.mubr.msk.f32.mxu0 %vm2061_vm0, %v2059_v1  ;;  %v650_v38 = vrot.slane %v1516_v35, %v649_v33 }
  0x8c   :  { %v657_v39 = vrot.slane %v1516_v35, %v656_v34  ;;  %1962 = vmatprep.subr.mxu1 %v2059_v1  ;;  %1964 = vmatprep.mubr.msk.f32.mxu1 %vm2061_vm0, %v2059_v1  ;;  %v664_v42 = vrot.slane %v1516_v35, %v663_v40  ;;  %v671_v43 = vrot.slane %v1516_v35, %v670_v41 }
  0x8d   :  { %645 = vbcast.lane.b32.xlu1 %v643_v36, 256  ;;  %638 = vbcast.lane.b32.xlu0 %v636_v37, 256  ;;  %v678_v46 = vrot.slane %v1516_v35, %v677_v44  ;;  %v685_v47 = vrot.slane %v1516_v35, %v684_v45 }
  0x8e   :  { %1963 = vmatpush3.msra.mxu1 %v2237_v20  ;;  %1967 = vmatprep.subr.mxu0 %v2059_v1 }
  0x8f   :  { %1972 = vmatprep.subr.mxu1 %v2059_v1 }
  0x91   :  { %652 = vbcast.lane.b32.xlu1 %v650_v38, 256  ;;  %659 = vbcast.lane.b32.xlu0 %v657_v39, 256 }
  0x95   :  { %666 = vbcast.lane.b32.xlu1 %v664_v42, 256  ;;  %673 = vbcast.lane.b32.xlu0 %v671_v43, 256 }
  0x99   :  { %680 = vbcast.lane.b32.xlu1 %v678_v46, 256  ;;  %687 = vbcast.lane.b32.xlu0 %v685_v47, 256 }
  0xe3   :  { %v105_v48 = vpop.f32.mrf.mxu0  ;;  %v175_v49 = vpop.f32.mrf.mxu1 }
  0xe4   :  { %2003 = vtanh.f32 %v105_v48 }
  0xe5   :  { %2005 = vtanh.f32 %v175_v49  ;;  %v1711_v50 = vpop.f32.mrf.mxu0  ;;  %v1746_v51 = vpop.f32.mrf.mxu1 }
  0xf1   :  { %v2004_v52 = vpop.eup %2003 }
  0xf2   :  { %v2006_v53 = vpop.eup %2005  ;;  %v607_v54 = vmul.f32 1.442695, %v2004_v52 }
  0xf3   :  { %v609_v55 = vmul.f32 1.442695, %v2006_v53 }
  0xf4   :  { %2007 = vpow2.f32 %v607_v54 }
  0xf5   :  { %2009 = vpow2.f32 %v609_v55 }
  0xff   :  { %v639_v56 = vpop.permute.xlu0 %638  ;;  %v646_v57 = vpop.permute.xlu1 %645 }
 0x101   :  { %v2008_v58 = vpop.eup %2007 }
 0x102   :  { %v2010_v59 = vpop.eup %2009  ;;  %v2528_v60 = vmul.f32 %v2008_v58, %v639_v56  ;;  %v2548_v58 = vsub.s32 %v2469_v27, %v2463_v26 }
 0x103   :  { %v2530_v61 = vmul.f32 %v2010_v59, %v646_v57  ;;  %v653_v7 = vpop.permute.xlu1 %652  ;;  %v660_v8 = vpop.permute.xlu0 %659 }
 0x104   :  { %714 = vperm.xlu1 %2002, %v2528_v60  }
 0x105   :  { %v245_v62 = vpop.f32.mrf.mxu0  ;;  %v315_v63 = vpop.f32.mrf.mxu1  ;;  %717 = vperm.xlu0 %2001, %v2530_v61  }
 0x106   :  { %2011 = vtanh.f32 %v245_v62 }
 0x107   :  { %2013 = vtanh.f32 %v315_v63  ;;  %v1781_v0 = vpop.f32.mrf.mxu0  ;;  %v1816_v2 = vpop.f32.mrf.mxu1 }
 0x108   :  { %v667_v25 = vpop.permute.xlu1 %666  ;;  %v674_v32 = vpop.permute.xlu0 %673 }
 0x10c   :  { %v681_v52 = vpop.permute.xlu1 %680  ;;  %v688_v55 = vpop.permute.xlu0 %687 }
 0x113   :  { %v2012_v3 = vpop.eup %2011 }
 0x114   :  { %v2014_v4 = vpop.eup %2013  ;;  %v611_v5 = vmul.f32 1.442695, %v2012_v3 }
 0x115   :  { %v613_v6 = vmul.f32 1.442695, %v2014_v4 }
 0x116   :  { %2015 = vpow2.f32 %v611_v5 }
 0x117   :  { %2017 = vpow2.f32 %v613_v6 }
 0x123   :  { %v2016_v9 = vpop.eup %2015 }
 0x124   :  { %v2018_v10 = vpop.eup %2017  ;;  %v2534_v11 = vmul.f32 %v2016_v9, %v653_v7 }
 0x125   :  { %v2536_v12 = vmul.f32 %v2018_v10, %v660_v8 }
 0x126   :  { %720 = vperm.xlu1 %2002, %v2534_v11  }
 0x127   :  { %v385_v13 = vpop.f32.mrf.mxu0  ;;  %v455_v14 = vpop.f32.mrf.mxu1  ;;  %723 = vperm.xlu0 %2001, %v2536_v12  }
 0x128   :  { %2019 = vtanh.f32 %v385_v13 }
 0x129   :  { %2021 = vtanh.f32 %v455_v14  ;;  %v1851_v15 = vpop.f32.mrf.mxu0  ;;  %v1886_v16 = vpop.f32.mrf.mxu1 }
 0x135   :  { %v2020_v17 = vpop.eup %2019 }
 0x136   :  { %v2022_v18 = vpop.eup %2021  ;;  %v615_v19 = vmul.f32 1.442695, %v2020_v17 }
 0x137   :  { %v617_v20 = vmul.f32 1.442695, %v2022_v18 }
 0x138   :  { %2023 = vpow2.f32 %v615_v19 }
 0x139   :  { %2025 = vpow2.f32 %v617_v20 }
 0x145   :  { %v2024_v35 = vpop.eup %2023 }
 0x146   :  { %v2026_v36 = vpop.eup %2025  ;;  %v2540_v37 = vmul.f32 %v2024_v35, %v667_v25 }
 0x147   :  { %v2542_v38 = vmul.f32 %v2026_v36, %v674_v32 }
 0x148   :  { %726 = vperm.xlu1 %2002, %v2540_v37  }
 0x149   :  { %v525_v39 = vpop.f32.mrf.mxu0  ;;  %v595_v42 = vpop.f32.mrf.mxu1  ;;  %729 = vperm.xlu0 %2001, %v2542_v38  }
 0x14a   :  { %2027 = vtanh.f32 %v525_v39 }
 0x14b   :  { %2029 = vtanh.f32 %v595_v42  ;;  %v1921_v43 = vpop.f32.mrf.mxu0  ;;  %v1956_v46 = vpop.f32.mrf.mxu1 }
 0x157   :  { %v2028_v47 = vpop.eup %2027 }
 0x158   :  { %v2030_v48 = vpop.eup %2029  ;;  %v619_v49 = vmul.f32 1.442695, %v2028_v47 }
 0x159   :  { %v621_v50 = vmul.f32 1.442695, %v2030_v48 }
 0x15a   :  { %2031 = vpow2.f32 %v619_v49 }
 0x15b   :  { %2033 = vpow2.f32 %v621_v50 }
 0x167   :  { %v2032_v51 = vpop.eup %2031 }
 0x168   :  { %v2034_v53 = vpop.eup %2033  ;;  %v703_v54 = vmul.f32 %v2032_v51, %v681_v52 }
 0x169   :  { %v704_v56 = vmul.f32 %v2034_v53, %v688_v55 }
 0x16a   :  { %732 = vperm.xlu1 %2002, %v703_v54  }
 0x16b   :  { %735 = vperm.xlu0 %2001, %v704_v56  }
 0x17f   :  { %v715_v57 = vpop.permute.xlu1 %714 }
 0x180   :  { %v718_v59 = vpop.permute.xlu0 %717  ;;  %v740_v0 = vrot.slane %v715_v57, %v2548_v58 }
 0x181   :  { %v744_v63 = vrot.slane %v718_v59, %v2548_v58 }
 0x183   :  { %v770_v5 = vsel %vm769_vm2, %v744_v63, %v740_v0 }
 0x1a1   :  { %v721_v62 = vpop.permute.xlu1 %720 }
 0x1a2   :  { %v724_v2 = vpop.permute.xlu0 %723  ;;  %v748_v3 = vrot.slane %v721_v62, %v2548_v58 }
 0x1a3   :  { %v752_v6 = vrot.slane %v724_v2, %v2548_v58 }
 0x1a4   :  { %v772_v7 = vsel %vm771_vm3, %v748_v3, %v770_v5 }
 0x1a5   :  { %v774_v10 = vsel %vm773_vm4, %v752_v6, %v772_v7 }
 0x1c3   :  { %v727_v4 = vpop.permute.xlu1 %726 }
 0x1c4   :  { %v730_v27 = vpop.permute.xlu0 %729  ;;  %v756_v8 = vrot.slane %v727_v4, %v2548_v58 }
 0x1c5   :  { %v760_v9 = vrot.slane %v730_v27, %v2548_v58 }
 0x1c6   :  { %v776_v13 = vsel %vm775_vm5, %v756_v8, %v774_v10 }
 0x1c7   :  { %v778_v18 = vsel %vm777_vm6, %v760_v9, %v776_v13 }
 0x1e5   :  { %v733_v14 = vpop.permute.xlu1 %732 }
 0x1e6   :  { %v736_v15 = vpop.permute.xlu0 %735  ;;  %v764_v16 = vrot.slane %v733_v14, %v2548_v58 }
 0x1e7   :  { %v768_v17 = vrot.slane %v736_v15, %v2548_v58 }
 0x1e8   :  { %v780_v19 = vsel %vm779_vm7, %v764_v16, %v778_v18 }
 0x1e9   :  { %v782_v20 = vsel %vm781_vm8, %v768_v17, %v780_v19 }
 0x1ea   :  { %v785_v25 = vsel %vm784_vm9, %v782_v20, 0.0 }
 0x1eb   :  { %786 = vadd.xlane.f32.xlu1 %v785_v25 }
 0x274   :  { %v787_v32 = vpop.xlane.xlu1 %786 }
 0x275   :  { %2035 = vrcp.f32 %v787_v32 }
 0x282   :  { %v2036_v35 = vpop.eup %2035 }
 0x283   :  { %v793_v36 = vrot.slane %v2036_v35, %v635_v31  ;;  %v797_v42 = vrot.slane %v2036_v35, %v642_v30  ;;  %v801_v46 = vrot.slane %v2036_v35, %v649_v33  ;;  %v805_v48 = vrot.slane %v2036_v35, %v656_v34 }
 0x285   :  { %v830_v39 = vmul.f32 %v793_v36, %v2528_v60  ;;  %v831_v43 = vmul.f32 %v797_v42, %v2530_v61  ;;  %v832_v47 = vmul.f32 %v801_v46, %v2534_v11  ;;  %v833_v31 = vmul.f32 %v805_v48, %v2536_v12 }
 0x286   :  { %v809_v60 = vrot.slane %v2036_v35, %v663_v40  ;;  %v813_v61 = vrot.slane %v2036_v35, %v670_v41  ;;  %v817_v11 = vrot.slane %v2036_v35, %v677_v44  ;;  %v821_v12 = vrot.slane %v2036_v35, %v684_v45 }
 0x287   :  { %840 = vperm.xlu0 %2001, %v830_v39  }
 0x288   :  { %v834_v30 = vmul.f32 %v809_v60, %v2540_v37  ;;  %v835_v33 = vmul.f32 %v813_v61, %v2542_v38  ;;  %v836_v34 = vmul.f32 %v817_v11, %v703_v54  ;;  %v837_v49 = vmul.f32 %v821_v12, %v704_v56 }
 0x28b   :  { %920 = vperm.xlu0 %2001, %v831_v43  }
 0x28f   :  { %1000 = vperm.xlu0 %2001, %v832_v47  }
 0x293   :  { %1080 = vperm.xlu0 %2001, %v833_v31  }
 0x297   :  { %1160 = vperm.xlu0 %2001, %v834_v30  }
 0x29b   :  { %1240 = vperm.xlu0 %2001, %v835_v33  }
 0x29f   :  { %1320 = vperm.xlu0 %2001, %v836_v34  }
 0x2a3   :  { %1400 = vperm.xlu0 %2001, %v837_v49  }
 0x302   :  { %v841_v40 = vpop.permute.xlu0 %840 }
 0x303   :  { %v845_v37 = vrot.slane %v841_v40, %v2548_v58 }
 0x305   :  { %1960 = vmatmul.mubr.msk.f32.vlgmr.msra.gmra.mxu0 %vm784_vm9, %v845_v37 }
 0x306   :  { %v921_v41 = vpop.permute.xlu0 %920  ;;  %1968 = vmatpush3.msra.mxu0 %v2312_v21  ;;  %1969 = vmatprep.mubr.msk.f32.mxu0 %vm2061_vm0, %v2059_v1 }
 0x307   :  { %v925_v44 = vrot.slane %v921_v41, %v2548_v58  ;;  %1977 = vmatprep.subr.mxu0 %v2059_v1 }
 0x309   :  { %1965 = vmatmul.mubr.msk.f32.vlgmr.msra.gmra.mxu1 %vm784_vm9, %v925_v44 }
 0x30a   :  { %v1001_v26 = vpop.permute.xlu0 %1000  ;;  %1973 = vmatpush3.msra.mxu1 %v2317_v22  ;;  %1974 = vmatprep.mubr.msk.f32.mxu1 %vm2061_vm0, %v2059_v1 }
 0x30b   :  { %v1005_v45 = vrot.slane %v1001_v26, %v2548_v58  ;;  %1982 = vmatprep.subr.mxu1 %v2059_v1 }
 0x30d   :  { %1970 = vmatmul.mubr.msk.f32.vlgmr.msra.gmra.mxu0 %vm784_vm9, %v1005_v45 }
 0x30e   :  { %v1081_v21 = vpop.permute.xlu0 %1080  ;;  %1978 = vmatpush3.msra.mxu0 %v2392_v23  ;;  %1979 = vmatprep.mubr.msk.f32.mxu0 %vm2061_vm0, %v2059_v1 }
 0x30f   :  { %v1085_v38 = vrot.slane %v1081_v21, %v2548_v58  ;;  %1987 = vmatprep.subr.mxu0 %v2059_v1 }
 0x311   :  { %1975 = vmatmul.mubr.msk.f32.vlgmr.msra.gmra.mxu1 %vm784_vm9, %v1085_v38 }
 0x312   :  { %v1161_v22 = vpop.permute.xlu0 %1160  ;;  %1983 = vmatpush3.msra.mxu1 %v2397_v24  ;;  %1984 = vmatprep.mubr.msk.f32.mxu1 %vm2061_vm0, %v2059_v1 }
 0x313   :  { %v1165_v50 = vrot.slane %v1161_v22, %v2548_v58  ;;  %1992 = vmatprep.subr.mxu1 %v2059_v1 }
 0x315   :  { %1980 = vmatmul.mubr.msk.f32.vlgmr.msra.gmra.mxu0 %vm784_vm9, %v1165_v50 }
 0x316   :  { %v1241_v23 = vpop.permute.xlu0 %1240  ;;  %1988 = vmatpush3.msra.mxu0 %v2476_v28  ;;  %1989 = vmatprep.mubr.msk.f32.mxu0 %vm2061_vm0, %v2059_v1 }
 0x317   :  { %v1245_v51 = vrot.slane %v1241_v23, %v2548_v58 }
 0x319   :  { %1985 = vmatmul.mubr.msk.f32.vlgmr.msra.gmra.mxu1 %vm784_vm9, %v1245_v51 }
 0x31a   :  { %v1321_v24 = vpop.permute.xlu0 %1320  ;;  %1993 = vmatpush3.msra.mxu1 %v2481_v29  ;;  %1994 = vmatprep.mubr.msk.f32.mxu1 %vm2061_vm0, %v2059_v1 }
 0x31b   :  { %v1325_v52 = vrot.slane %v1321_v24, %v2548_v58 }
 0x31d   :  { %1990 = vmatmul.mubr.msk.f32.vlgmr.msra.gmra.mxu0 %vm784_vm9, %v1325_v52 }
 0x31e   :  { %v1401_v53 = vpop.permute.xlu0 %1400 }
 0x31f   :  { %v1405_v28 = vrot.slane %v1401_v53, %v2548_v58 }
 0x321   :  { %1995 = vmatmul.mubr.msk.f32.vlgmr.msra.gmra.mxu1 %vm784_vm9, %v1405_v28 }
 0x3c5   :  { %v914_v54 = vpop.f32.mrf.mxu0 }
 0x3c7   :  { %v1961_v55 = vpop.f32.mrf.mxu0 }
 0x3c9   :  { %v994_v56 = vpop.f32.mrf.mxu1 }
 0x3ca   :  { %v1486_v3 = vrot.slane %v994_v56, 7 }
 0x3cb   :  { %v1966_v57 = vpop.f32.mrf.mxu1 }
 0x3cc   :  { %v1487_v58 = vsel %vm769_vm2, %v1486_v3, %v914_v54 }
 0x3cd   :  { %v1074_v59 = vpop.f32.mrf.mxu0 }
 0x3ce   :  { %v1488_v4 = vrot.slane %v1074_v59, 6 }
 0x3cf   :  { %v1971_v62 = vpop.f32.mrf.mxu0 }
 0x3d0   :  { %v1489_v9 = vsel %vm771_vm3, %v1488_v4, %v1487_v58 }
 0x3d1   :  { %v1154_v63 = vpop.f32.mrf.mxu1 }
 0x3d2   :  { %v1490_v6 = vrot.slane %v1154_v63, 5 }
 0x3d3   :  { %v1976_v29 = vpop.f32.mrf.mxu1 }
 0x3d4   :  { %v1491_v14 = vsel %vm773_vm4, %v1490_v6, %v1489_v9 }
 0x3d5   :  { %v1234_v0 = vpop.f32.mrf.mxu0 }
 0x3d6   :  { %v1492_v7 = vrot.slane %v1234_v0, 4 }
 0x3d7   :  { %v1981_v2 = vpop.f32.mrf.mxu0 }
 0x3d8   :  { %v1493_v15 = vsel %vm775_vm5, %v1492_v7, %v1491_v14 }
 0x3d9   :  { %v1314_v1 = vpop.f32.mrf.mxu1 }
 0x3da   :  { %v1494_v8 = vrot.slane %v1314_v1, 3 }
 0x3db   :  { %v1986_v5 = vpop.f32.mrf.mxu1 }
 0x3dc   :  { %v1495_v17 = vsel %vm777_vm6, %v1494_v8, %v1493_v15 }
 0x3dd   :  { %v1394_v27 = vpop.f32.mrf.mxu0 }
 0x3de   :  { %v1496_v10 = vrot.slane %v1394_v27, 2 }
 0x3df   :  { %v1991_v13 = vpop.f32.mrf.mxu0 }
 0x3e0   :  { %v1497_v20 = vsel %vm779_vm7, %v1496_v10, %v1495_v17 }
 0x3e1   :  { %v1474_v16 = vpop.f32.mrf.mxu1 }
 0x3e2   :  { %v1498_v18 = vrot.slane %v1474_v16, 1 }
 0x3e3   :  { %v1996_v19 = vpop.f32.mrf.mxu1 }
 0x3e4   :  { %v1499_v25 = vsel %vm781_vm8, %v1498_v18, %v1497_v20 }
 0x3e5   :  { %1501 = vst [vmem:[#allocation2] sm:$0xff] %v1499_v25 }
 0x3e6   :  { %2048 = shalt.err (!%p2045_p4)
}
 0x3e7   :  { %1511 = dma.vmem_to_hbm [thread:$0]  %s1509_s5, 128, %s2639_s3, [#allocation3]  }
 0x3e8   :  { %2057 = dma.done.wait [#allocation3], 128  }
 0x3e9   :  { %2058 = vsyncadd [#allocation3], 4294967168 }
 0x3ea   :  { %1515 = vsyncpa [#allocation3], 1 }

</bundles_post_ra>
